<compile_context>
chip_gen: v5e
topology: v5e:2x2
jax: 0.10.0
libtpu: 0.0.40
codegen_flags: <defaults>
</compile_context>

<pallas_src>
import functools

import jax
import jax.numpy as jnp
from jax.experimental import pallas as pl
from jax.experimental.pallas import tpu as pltpu

_LANES = 128


def _round_up(x, m):
    return ((x + m - 1) // m) * m


def _neg_sampling_kernel(x_ref, out_ref, *, n_total, n_cols, sub_rows):
    """Per-lane partial sums of:
         logsigmoid(-s)                       for every valid element
       + s                                    for valid elements whose flat
                                              index is in column 0 of (B, K).
    Elements whose flat index >= n_total (OOB rows of the last grid block or
    lane padding) are masked with a select, so garbage in OOB reads never
    contributes (select also neutralises NaN/Inf garbage)."""
    tile_rows, lanes = x_ref.shape
    base = pl.program_id(0) * (tile_rows * lanes)

    def local_iota(nrows):
        r = jax.lax.broadcasted_iota(jnp.int32, (nrows, lanes), 0)
        c = jax.lax.broadcasted_iota(jnp.int32, (nrows, lanes), 1)
        return r * lanes + c

    def chunk_contrib(s_raw, idx0, iota):
        s = s_raw.astype(jnp.float32)
        idx = idx0 + iota                      # flat index into scores
        # Numerically stable logsigmoid(-s) = -softplus(s).
        ls_neg = -jnp.maximum(s, 0.0) - jnp.log1p(jnp.exp(-jnp.abs(s)))
        valid = idx < n_total
        contrib = jnp.where(valid, ls_neg, 0.0)
        # Positive-column correction: logsigmoid(x) = x + logsigmoid(-x).
        contrib = contrib + jnp.where(valid & (idx % n_cols == 0), s, 0.0)
        return jnp.sum(contrib, axis=0, keepdims=True)

    acc = jnp.zeros((1, lanes), jnp.float32)
    n_full = tile_rows // sub_rows
    rem = tile_rows - n_full * sub_rows

    if n_full > 0:
        iota_sub = local_iota(sub_rows)        # hoisted: loop-invariant
        def body(c, a):
            r0 = pl.multiple_of(c * sub_rows, sub_rows)
            return a + chunk_contrib(x_ref[pl.ds(r0, sub_rows), :],
                                     base + r0 * lanes, iota_sub)
        acc = jax.lax.fori_loop(0, n_full, body, acc, unroll=True)
    if rem > 0:
        r0 = n_full * sub_rows                 # static slice start
        acc = acc + chunk_contrib(x_ref[r0:, :], base + r0 * lanes,
                                  local_iota(rem))

    out_ref[...] = acc


def negative_sampling_loss(scores, *, tile_rows=8192, sub_rows=512):
    """scores: (B, 1 + n_negative_samples) float array -> scalar f32 loss.

    tile_rows: rows of the lane-dense (rows, 128) slab per grid step.
      Default 8192 -> 4 MiB f32 / 2 MiB bf16 DMA blocks: big enough to hide the
      per-step overhead on every generation.  On v7x (3.2 TB/s HBM, 64 MiB
      VMEM) up to 16384 is reasonable; on v5e 4096-8192 is plenty.
    sub_rows: in-kernel sub-chunk size that bounds f32 temporaries (~2x input
      buffers total VMEM instead of 4-6x the block).
    """
    B, K = scores.shape
    N = B * K
    itemsize = jnp.dtype(scores.dtype).itemsize
    packing = {1: 32, 2: 16, 4: 8}.get(itemsize, 8)

    flat = scores.reshape(-1)                  # zero-copy flat view
    if N % _LANES != 0:
        # Rare fallback (B*K not lane-aligned): the (rows, 128) reshape needs
        # lane alignment, so pad the flat view once.  Pad values are masked
        # out in-kernel (idx >= N), so zeros are fine.
        # TODO(synk): a 1D flat BlockSpec path would avoid this copy too.
        flat = jnp.pad(flat, (0, _LANES - N % _LANES))
    rows = flat.shape[0] // _LANES
    slab = flat.reshape(rows, _LANES)          # zero-copy when no pad occurred

    # --- block-size selection (respects the (packing, 128) block constraint) --
    sub_rows = max(packing, _round_up(int(sub_rows), packing))
    tile_rows = max(packing, int(tile_rows))
    if tile_rows > sub_rows:
        tile_rows = _round_up(tile_rows, sub_rows)   # sub-chunks tile evenly
    else:
        tile_rows = _round_up(tile_rows, packing)
    if tile_rows >= rows:
        tile_rows = rows                       # single block == full row extent
    num_tiles = pl.cdiv(rows, tile_rows)
    assert num_tiles * tile_rows * _LANES < 2**31   # int32 flat-index math

    partials = pl.pallas_call(
        functools.partial(_neg_sampling_kernel,
                          n_total=N, n_cols=K, sub_rows=sub_rows),
        out_shape=jax.ShapeDtypeStruct((num_tiles, _LANES), jnp.float32),
        grid_spec=pltpu.PrefetchScalarGridSpec(
            num_scalar_prefetch=0,
            grid=(num_tiles,),
            in_specs=[pl.BlockSpec((tile_rows, _LANES), lambda i: (i, 0))],
            out_specs=pl.BlockSpec((1, _LANES), lambda i: (i, 0)),
        ),
        compiler_params=pltpu.CompilerParams(
            dimension_semantics=("parallel",),
            vmem_limit_bytes=32 * 1024 * 1024,
        ),
    )(slab)

    # Single tiny cross-lane / cross-tile reduce in the wrapper.
    return -jnp.sum(partials) / jnp.float32(B)


def _reference(scores):
    s = scores.astype(jnp.float32)
    B = s.shape[0]
    positive = jax.nn.log_sigmoid(s[:, 0])
    negatives = jnp.sum(jax.nn.log_sigmoid(-s[:, 1:]), axis=1)
    return -jnp.sum(positive + negatives) / B


if __name__ == "__main__":
    key = jax.random.PRNGKey(0)
    k1, k2, k3 = jax.random.split(key, 3)

    # Case 1: typical module usage (K = 1 + 7 = 8), lane-misaligned fallback.
    scores1 = jax.random.normal(k1, (8, 8), dtype=jnp.float32) * 2.0
    loss1 = jax.block_until_ready(negative_sampling_loss(scores1))
    ref1 = jax.block_until_ready(_reference(scores1))
    assert jnp.allclose(loss1, ref1, rtol=1e-5, atol=1e-5), (loss1, ref1)

    # Case 2: B*K is a multiple of 128 -> zero-copy slab.  Run once with
    # defaults (single full-extent block + static remainder chunk) and once
    # with tiny tiles to exercise the multi-tile grid, the OOB last block and
    # the in-kernel fori_loop sub-chunking.
    scores2 = jax.random.normal(k2, (64, 34), dtype=jnp.float32) * 3.0
    ref2 = jax.block_until_ready(_reference(scores2))
    loss2a = jax.block_until_ready(negative_sampling_loss(scores2))
    loss2b = jax.block_until_ready(
        negative_sampling_loss(scores2, tile_rows=16, sub_rows=8))
    assert jnp.allclose(loss2a, ref2, rtol=1e-5, atol=1e-4), (loss2a, ref2)
    assert jnp.allclose(loss2b, ref2, rtol=1e-5, atol=1e-4), (loss2b, ref2)

    # Case 3: bf16 input (16-row sublane packing path, in-kernel f32 upcast).
    scores3 = (jax.random.normal(k3, (32, 8), dtype=jnp.float32) * 2.0
               ).astype(jnp.bfloat16)
    loss3 = jax.block_until_ready(negative_sampling_loss(scores3))
    ref3 = jax.block_until_ready(_reference(scores3))
    assert jnp.allclose(loss3, ref3, rtol=1e-4, atol=1e-3), (loss3, ref3)

    print("KERNEL_OK")
</pallas_src>

<mosaic_0001>
module attributes {stable_mosaic.version = 11 : i64} {
  func.func @_neg_sampling_kernel(%arg0: i32, %arg1: memref<1x128xf32, #tpu.memory_space<vmem>>, %arg2: memref<1x128xf32, #tpu.memory_space<vmem>>) attributes {dimension_semantics = [#tpu.dimension_semantics<parallel>], iteration_bounds = array<i64: 1>, scalar_prefetch = 0 : i64, scratch_operands = 0 : i64, tpu.core_type = #tpu.core_type<tc>, window_params = [{transform_indices = @transform_0, window_bounds = array<i64: 1, 128>}, {transform_indices = @transform_1, window_bounds = array<i64: 1, 128>}]} {
    %c128_i32 = arith.constant 128 : i32
    %0 = arith.muli %arg0, %c128_i32 : i32
    %cst = arith.constant 0.000000e+00 : f32
    %1 = vector.broadcast %cst : f32 to vector<1x128xf32>
    %c0 = arith.constant 0 : index
    %c0_0 = arith.constant 0 : index
    %2 = vector.load %arg1[%c0, %c0_0] : memref<1x128xf32, #tpu.memory_space<vmem>>, vector<1x128xf32>
    %c0_i32 = arith.constant 0 : i32
    %3 = arith.addi %0, %c0_i32 : i32
    %4 = tpu.iota {dimensions = array<i32: 0>} : vector<1x128xi32>
    %5 = tpu.iota {dimensions = array<i32: 1>} : vector<1x128xi32>
    %c128_i32_1 = arith.constant 128 : i32
    %6 = vector.broadcast %c128_i32_1 : i32 to vector<1x128xi32>
    %7 = arith.muli %4, %6 : vector<1x128xi32>
    %8 = arith.addi %7, %5 : vector<1x128xi32>
    %9 = vector.broadcast %3 : i32 to vector<1x128xi32>
    %10 = arith.addi %9, %8 : vector<1x128xi32>
    %cst_2 = arith.constant 0.000000e+00 : f32
    %11 = vector.broadcast %cst_2 : f32 to vector<1x128xf32>
    %12 = arith.maximumf %2, %11 : vector<1x128xf32>
    %cst_3 = arith.constant 0.000000e+00 : f32
    %13 = vector.broadcast %cst_3 : f32 to vector<1x128xf32>
    %14 = arith.subf %13, %12 : vector<1x128xf32>
    %15 = math.absf %2 : vector<1x128xf32>
    %cst_4 = arith.constant 0.000000e+00 : f32
    %16 = vector.broadcast %cst_4 : f32 to vector<1x128xf32>
    %17 = arith.subf %16, %15 : vector<1x128xf32>
    %18 = math.exp %17 : vector<1x128xf32>
    %19 = math.log1p %18 : vector<1x128xf32>
    %20 = arith.subf %14, %19 : vector<1x128xf32>
    %c64_i32 = arith.constant 64 : i32
    %21 = vector.broadcast %c64_i32 : i32 to vector<1x128xi32>
    %22 = arith.cmpi slt, %10, %21 : vector<1x128xi32>
    %cst_5 = arith.constant 0.000000e+00 : f32
    %23 = vector.broadcast %cst_5 : f32 to vector<1x128xf32>
    %24 = arith.select %22, %20, %23 : vector<1x128xi1>, vector<1x128xf32>
    %c8_i32 = arith.constant 8 : i32
    %c0_i32_6 = arith.constant 0 : i32
    %25 = arith.cmpi eq, %c8_i32, %c0_i32_6 : i32
    %c1_i32 = arith.constant 1 : i32
    %26 = arith.select %25, %c1_i32, %c8_i32 : i32
    %27 = vector.broadcast %26 : i32 to vector<1x128xi32>
    %28 = arith.remsi %10, %27 : vector<1x128xi32>
    %c0_i32_7 = arith.constant 0 : i32
    %29 = vector.broadcast %c0_i32_7 : i32 to vector<1x128xi32>
    %30 = arith.cmpi ne, %28, %29 : vector<1x128xi32>
    %c0_i32_8 = arith.constant 0 : i32
    %31 = vector.broadcast %c0_i32_8 : i32 to vector<1x128xi32>
    %32 = arith.cmpi slt, %28, %31 : vector<1x128xi32>
    %c0_i32_9 = arith.constant 0 : i32
    %33 = arith.cmpi slt, %26, %c0_i32_9 : i32
    %34 = vector.broadcast %33 : i1 to vector<1x128xi1>
    %35 = vector.broadcast %34 : vector<1x128xi1> to vector<1x128xi1>
    %36 = arith.xori %32, %35 : vector<1x128xi1>
    %37 = arith.andi %36, %30 : vector<1x128xi1>
    %38 = vector.broadcast %26 : i32 to vector<1x128xi32>
    %39 = arith.addi %28, %38 : vector<1x128xi32>
    %40 = arith.select %37, %39, %28 : vector<1x128xi1>, vector<1x128xi32>
    %c0_i32_10 = arith.constant 0 : i32
    %41 = vector.broadcast %c0_i32_10 : i32 to vector<1x128xi32>
    %42 = arith.cmpi eq, %40, %41 : vector<1x128xi32>
    %43 = arith.andi %22, %42 : vector<1x128xi1>
    %cst_11 = arith.constant 0.000000e+00 : f32
    %44 = vector.broadcast %cst_11 : f32 to vector<1x128xf32>
    %45 = arith.select %43, %2, %44 : vector<1x128xi1>, vector<1x128xf32>
    %46 = arith.addf %24, %45 : vector<1x128xf32>
    %cst_12 = arith.constant dense<0.000000e+00> : vector<128xf32>
    %47 = vector.multi_reduction <add>, %46, %cst_12 [0] : vector<1x128xf32> to vector<128xf32>
    %48 = vector.shape_cast %47 : vector<128xf32> to vector<1x128xf32>
    %49 = arith.addf %1, %48 : vector<1x128xf32>
    %c0_13 = arith.constant 0 : index
    %c0_14 = arith.constant 0 : index
    %50 = vector.load %arg2[%c0_13, %c0_14] : memref<1x128xf32, #tpu.memory_space<vmem>>, vector<1x128xf32>
    tpu.vector_store %arg2[%c0_13, %c0_14], %49 {strides = array<i32>} : memref<1x128xf32, #tpu.memory_space<vmem>>, vector<1x128xf32>,
    return
  }
  func.func @transform_0(%arg0: i32) -> (i32, i32) {
    %c0_i32 = arith.constant 0 : i32
    %c0_i32_0 = arith.constant 0 : i32
    return %arg0, %c0_i32 : i32, i32
  }
  func.func @transform_1(%arg0: i32) -> (i32, i32) {
    %c0_i32 = arith.constant 0 : i32
    %c0_i32_0 = arith.constant 0 : i32
    return %arg0, %c0_i32 : i32, i32
  }
}

</mosaic_0001>

<bundles_post_ra>
// kernel: tpu_custom_call.1
= control target key start
LH: loop header
LB: loop body
LE: loop exit
PB: predicated region body
PF: predicated region fallthrough
CT: control target
= control target key end

     0   :  { %6 = vsyncpa [#allocation3], 0  ;;  %s163_s0 = inlined_call_operand.hbm [shape: f32[1,128], index: 0, kind: input, shape index: {}]   ;;  %s164_s1 = inlined_call_operand.hbm [shape: f32[1,128], index: 1, kind: output, shape index: {}]  }
   0x1   :  { %7 = vsyncpa [#allocation4], 0  ;;  %s13_s8 = sshll.u32 %s163_s0, 4  ;;  %s145_s9 = smov [#allocation2]   ;;  %s14_s8 = int_to_ptr.hbm [resolvable:$true] %s13_s8 }
   0x2   :  { %s15_s10 = sshll.u32 %s145_s9, 4  ;;  %s16_s10 = int_to_ptr.vmem [resolvable:$true] %s15_s10 }
   0x3   :  { %18 = dma.hbm_to_vmem [thread:$0]  %s14_s8, 16, %s16_s10, [#allocation3]  }
   0x4   :  { %141 = dma.done.wait [#allocation3], 16  }
   0x5   :  { %142 = vsyncadd [#allocation3], 4294967280  ;;  %v25_v0 = vlaneseq  ;;  %v24_v5 = vld [vmem:[#allocation2] sm:$0x1]  ;;  %s146_s0 = smov [#allocation5]   ;;  %s77_s14 = sshll.u32 %s164_s1, 4  ;;  %s78_s14 = int_to_ptr.hbm [resolvable:$true] %s77_s14 }
   0x6   :  { %v35_v6 = vand.u32 2147483647, %v24_v5  ;;  %v33_v20 = vmax.f32 %v24_v5, 0.0  ;;  %s75_s11 = sshll.u32 %s146_s0, 4  ;;  %s76_s11 = int_to_ptr.vmem [resolvable:$true] %s75_s11 }
   0x7   :  { %v26_v1 = vshrl.u32 %v25_v0, 7  ;;  %v28_v2 = vand.u32 127, %v25_v0 }
   0x8   :  { %v36_v8 = vsub.f32 0.0, %v35_v6  ;;  %v34_v24 = vsub.f32 0.0, %v33_v20 }
   0x9   :  { %v29_v3 = vmul.u32 128, %v26_v1 }
   0xa   :  { %v37_v10 = vmul.f32 1.442695, %v36_v8 }
   0xb   :  { %v30_v4 = vadd.s32 %v29_v3, %v28_v2 }
   0xc   :  { %89 = vpow2.f32 %v37_v10 }
   0xd   :  { %vm51_vm0 = vcmp.lt.s32.totalorder %v30_v4, 0  ;;  %v52_v7 = vsub.s32 0, %v30_v4  ;;  %vm49_vm4 = vcmp.lt.s32.totalorder %v30_v4, 64 }
   0xf   :  { %v53_v9 = vsel %vm51_vm0, %v52_v7, %v30_v4 }
  0x10   :  { %v55_v11 = vand.u32 7, %v53_v9 }
  0x12   :  { %v56_v12 = vsub.s32 0, %v55_v11  ;;  %v90_v14 = vpop.eup %89 }
  0x13   :  { %v39_v16 = vadd.f32 1.0, %v90_v14  ;;  %v42_v17 = vmul.f32 -0.5, %v90_v14  ;;  %v45_v21 = vand.u32 2147483647, %v90_v14 }
  0x14   :  { %v57_v13 = vsel %vm51_vm0, %v56_v12, %v55_v11 }
  0x15   :  { %vm58_vm1 = vcmp.ne.s32.totalorder %v57_v13, 0  ;;  %vm59_vm2 = vcmp.lt.s32.totalorder %v57_v13, 0  ;;  %v61_v15 = vadd.s32 8, %v57_v13  ;;  %91 = vlog2.f32 %v39_v16 }
  0x16   :  { %vm60_vm3 = vmand %vm59_vm2, %vm58_vm1  ;;  %v43_v18 = vadd.f32 1.0, %v42_v17  ;;  %vm46_vm6 = vcmp.lt.f32.partialorder %v45_v21, 0.0004427343 }
  0x17   :  { %v62_v19 = vsel %vm60_vm3, %v61_v15, %v57_v13 }
  0x18   :  { %vm63_vm5 = vcmp.eq.s32.totalorder %v62_v19, 0  ;;  %v44_v22 = vmul.f32 %v90_v14, %v43_v18 }
  0x19   :  { %vm64_vm7 = vmand %vm49_vm4, %vm63_vm5 }
  0x1a   :  { %v65_v28 = vsel %vm64_vm7, %v24_v5, 0.0 }
  0x1b   :  { %v92_v23 = vpop.eup %91 }
  0x1c   :  { %v41_v25 = vmul.f32 0.6931472, %v92_v23 }
  0x1e   :  { %v47_v26 = vsel %vm46_vm6, %v44_v22, %v41_v25 }
  0x1f   :  { %v48_v27 = vsub.f32 %v34_v24, %v47_v26 }
  0x21   :  { %v50_v29 = vsel %vm49_vm4, %v48_v27, 0.0 }
  0x22   :  { %v66_v30 = vadd.f32 %v65_v28, %v50_v29 }
  0x24   :  { %69 = vst [vmem:[#allocation5] sm:$0x1] %v66_v30 }
  0x25   :  { %80 = dma.vmem_to_hbm [thread:$0]  %s76_s11, 16, %s78_s14, [#allocation4]  }
  0x26   :  { %143 = dma.done.wait [#allocation4], 16  }
  0x27   :  { %144 = vsyncadd [#allocation4], 4294967280 }
  0x28   :  { %85 = vsyncpa [#allocation3], 1 }
  0x29   :  { %86 = vsyncpa [#allocation4], 1 }

</bundles_post_ra>
